<compile_context>
chip_gen: v7x
topology: tpu7x:2x2x1
jax: 0.10.0
libtpu: 0.0.40
codegen_flags: <defaults>
</compile_context>

<pallas_src>
import functools

import jax
import jax.numpy as jnp
from jax.experimental import pallas as pl
from jax.experimental.pallas import tpu as pltpu


def _focal_ce_sum_kernel(t_ref, x_ref, o_ref, *, n_total, tile_n, tiles_per_split):
    """Accumulates sum_i (logsumexp(x_i) - x_i[t_i]) over this split's row tiles."""
    i = pl.program_id(1)  # reduction axis (tiles within this split)

    @pl.when(i == 0)
    def _init():
        o_ref[...] = jnp.zeros_like(o_ref)

    x = x_ref[...].astype(jnp.float32)   # (TILE_N, C); f32 math regardless of ingest dtype
    t = t_ref[...]                       # (TILE_N, 1) int32
    tn, c = x.shape

    # Global row ids of this tile; rows >= n_total are padding (unspecified data) -> masked.
    tile_idx = pl.program_id(0) * tiles_per_split + i
    row_id = jax.lax.broadcasted_iota(jnp.int32, (tn, 1), 0) + tile_idx * tile_n
    valid = row_id < n_total

    # Numerically stable per-row logsumexp.
    m = jnp.max(x, axis=-1, keepdims=True)                               # (TILE_N, 1)
    lse = jnp.log(jnp.sum(jnp.exp(x - m), axis=-1, keepdims=True)) + m   # (TILE_N, 1)

    # Gather the target-class logit with a select (no one-hot float multiply).
    cls_idx = jax.lax.broadcasted_iota(jnp.int32, (tn, c), 1)            # (TILE_N, C)
    tgt_logit = jnp.sum(jnp.where(cls_idx == t, x, 0.0), axis=-1, keepdims=True)

    per_sample = jnp.where(valid, lse - tgt_logit, 0.0)                  # (TILE_N, 1)
    o_ref[...] += jnp.sum(per_sample)


def _pick_tile_n(n, c, itemsize, budget_bytes=8 * 1024 * 1024):
    """Largest row-tile whose (TILE_N, C) block fits the per-buffer VMEM budget.

    Pallas double-buffers each input, so logits VMEM use ~= 2 * TILE_N * C * itemsize.
    Tile is a multiple of 16 (valid sublane packing for f32 and bf16) unless it
    covers the full batch.
    """
    max_rows = max(budget_bytes // max(c * itemsize, 1), 1)
    tile = min(n, max_rows, 2048)
    if tile < n:
        tile = max((tile // 16) * 16, 16)
    return tile


def focal_loss(inputs, targets, *, alpha=1.0, gamma=2.0, tile_n=None):
    """inputs: (N, C) float logits; targets: (N,) int class ids. Returns scalar f32."""
    n, c = inputs.shape
    itemsize = jnp.dtype(inputs.dtype).itemsize
    if tile_n is None:
        tile_n = _pick_tile_n(n, c, itemsize)
    num_tiles = pl.cdiv(n, tile_n)
    num_splits = 2 if num_tiles >= 2 else 1       # one partial sum per TensorCore (v7x)
    tiles_per_split = pl.cdiv(num_tiles, num_splits)

    t2 = targets.astype(jnp.int32).reshape(n, 1)

    def tile_map(p, i):
        # Clamp so overflow tiles of the last split re-read the last real tile
        # (their rows are fully masked in-kernel), keeping every DMA in bounds.
        return (jnp.minimum(p * tiles_per_split + i, num_tiles - 1), 0)

    kernel = functools.partial(
        _focal_ce_sum_kernel,
        n_total=n, tile_n=tile_n, tiles_per_split=tiles_per_split,
    )

    cost = pl.CostEstimate(
        flops=6 * n * c,
        transcendentals=n * c + n,
        bytes_accessed=n * c * itemsize + n * 4 + num_splits * 4,
    )

    partials = pl.pallas_call(
        kernel,
        out_shape=jax.ShapeDtypeStruct((num_splits, 1, 1), jnp.float32),
        grid=(num_splits, tiles_per_split),
        in_specs=[
            pl.BlockSpec((tile_n, 1), tile_map),   # targets (int32)
            pl.BlockSpec((tile_n, c), tile_map),   # logits, streamed at ingest dtype
        ],
        out_specs=pl.BlockSpec((1, 1, 1), lambda p, i: (p, 0, 0)),
        compiler_params=pltpu.CompilerParams(
            dimension_semantics=("parallel", "arbitrary"),
            vmem_limit_bytes=48 * 1024 * 1024,
        ),
        cost_estimate=cost,
    )(t2, inputs)

    # Tiny finalize in plain JAX: mean CE over the batch, then the focal transform.
    ce = jnp.sum(partials) / jnp.float32(n)
    pt = jnp.exp(-ce)
    g = float(gamma)
    base = 1.0 - pt
    if g == int(g) and g >= 0:
        w = jax.lax.integer_pow(base, int(g))      # avoid log/exp pow and 0**gamma edge cases
    else:
        w = base ** g
    return jnp.float32(alpha) * w * ce


def _focal_loss_ref(inputs, targets, *, alpha=1.0, gamma=2.0):
    # Pure-JAX reference matching torch.nn.functional.cross_entropy + focal wrap.
    logp = jax.nn.log_softmax(inputs.astype(jnp.float32), axis=-1)
    ce = -jnp.mean(jnp.take_along_axis(logp, targets[:, None].astype(jnp.int32), axis=-1))
    pt = jnp.exp(-ce)
    return alpha * (1.0 - pt) ** gamma * ce


if __name__ == "__main__":
    key = jax.random.PRNGKey(0)
    k1, k2, k3, k4, k5, k6 = jax.random.split(key, 6)

    # Case 1: single-tile path (batch=8, classes=128).
    n1, c1 = 8, 128
    logits1 = jax.random.normal(k1, (n1, c1), dtype=jnp.float32) * 2.0
    targets1 = jax.random.randint(k2, (n1,), 0, c1, dtype=jnp.int32)
    out1 = jax.block_until_ready(focal_loss(logits1, targets1, alpha=1.0, gamma=2.0))
    ref1 = _focal_loss_ref(logits1, targets1, alpha=1.0, gamma=2.0)
    assert jnp.allclose(out1, ref1, rtol=1e-5, atol=1e-5), (out1, ref1)

    # Case 2: multi-tile path with ragged last tile (exercises the 2-way TC split, the
    # clamped index_map and the padded-row mask): batch=40, classes=256, TILE_N=16.
    n2, c2 = 40, 256
    logits2 = jax.random.normal(k3, (n2, c2), dtype=jnp.float32) * 2.0
    targets2 = jax.random.randint(k4, (n2,), 0, c2, dtype=jnp.int32)
    out2 = jax.block_until_ready(focal_loss(logits2, targets2, alpha=1.0, gamma=2.0, tile_n=16))
    ref2 = _focal_loss_ref(logits2, targets2, alpha=1.0, gamma=2.0)
    assert jnp.allclose(out2, ref2, rtol=1e-5, atol=1e-5), (out2, ref2)

    # Case 3: bf16 ingest path (streamed as bf16, f32 math in-kernel).
    n3, c3 = 64, 128
    logits3 = (jax.random.normal(k5, (n3, c3), dtype=jnp.float32) * 2.0).astype(jnp.bfloat16)
    targets3 = jax.random.randint(k6, (n3,), 0, c3, dtype=jnp.int32)
    out3 = jax.block_until_ready(focal_loss(logits3, targets3, alpha=1.0, gamma=2.0, tile_n=16))
    ref3 = _focal_loss_ref(logits3, targets3, alpha=1.0, gamma=2.0)
    assert jnp.allclose(out3, ref3, rtol=2e-2, atol=2e-2), (out3, ref3)

    print("KERNEL_OK")
</pallas_src>

<mosaic_0001>
module attributes {stable_mosaic.version = 11 : i64} {
  func.func @_focal_ce_sum_kernel(%arg0: i32, %arg1: i32, %arg2: memref<8x1xi32, #tpu.memory_space<vmem>>, %arg3: memref<8x128xf32, #tpu.memory_space<vmem>>, %arg4: memref<1x1x1xf32, #tpu.memory_space<vmem>>) attributes {dimension_semantics = [#tpu.dimension_semantics<parallel>, #tpu.dimension_semantics<arbitrary>], iteration_bounds = array<i64: 1, 1>, scalar_prefetch = 0 : i64, scratch_operands = 0 : i64, tpu.core_type = #tpu.core_type<tc>, window_params = [{transform_indices = @transform_0, window_bounds = array<i64: 8, 1>}, {transform_indices = @transform_1, window_bounds = array<i64: 8, 128>}, {transform_indices = @transform_2, window_bounds = array<i64: 1, 1, 1>}]} {
    %c0_i32 = arith.constant 0 : i32
    %0 = arith.cmpi eq, %arg1, %c0_i32 : i32
    %1 = arith.extui %0 : i1 to i32
    %c0_i32_0 = arith.constant 0 : i32
    %2 = arith.cmpi ne, %1, %c0_i32_0 : i32
    scf.if %2 {
      %cst_16 = arith.constant 0.000000e+00 : f32
      %40 = vector.broadcast %cst_16 : f32 to vector<1x1x1xf32>
      %c0_17 = arith.constant 0 : index
      %c0_18 = arith.constant 0 : index
      %c0_19 = arith.constant 0 : index
      %41 = vector.load %arg4[%c0_17, %c0_18, %c0_19] : memref<1x1x1xf32, #tpu.memory_space<vmem>>, vector<1x1x1xf32>
      tpu.vector_store %arg4[%c0_17, %c0_18, %c0_19], %40 {strides = array<i32>} : memref<1x1x1xf32, #tpu.memory_space<vmem>>, vector<1x1x1xf32>,
    } else {
    }
    %c0 = arith.constant 0 : index
    %c0_1 = arith.constant 0 : index
    %3 = vector.load %arg3[%c0, %c0_1] : memref<8x128xf32, #tpu.memory_space<vmem>>, vector<8x128xf32>
    %c0_2 = arith.constant 0 : index
    %c0_3 = arith.constant 0 : index
    %4 = vector.load %arg2[%c0_2, %c0_3] : memref<8x1xi32, #tpu.memory_space<vmem>>, vector<8x1xi32>
    %c1_i32 = arith.constant 1 : i32
    %5 = arith.muli %arg0, %c1_i32 : i32
    %6 = arith.addi %5, %arg1 : i32
    %7 = tpu.iota {dimensions = array<i32: 0>} : vector<8x1xi32>
    %c8_i32 = arith.constant 8 : i32
    %8 = arith.muli %6, %c8_i32 : i32
    %9 = vector.broadcast %8 : i32 to vector<8x1xi32>
    %10 = arith.addi %7, %9 : vector<8x1xi32>
    %c8_i32_4 = arith.constant 8 : i32
    %11 = vector.broadcast %c8_i32_4 : i32 to vector<8x1xi32>
    %12 = arith.cmpi slt, %10, %11 : vector<8x1xi32>
    %cst = arith.constant dense<0xFF800000> : vector<8xf32>
    %13 = vector.multi_reduction <maximumf>, %3, %cst [1] : vector<8x128xf32> to vector<8xf32>
    %14 = vector.shape_cast %13 : vector<8xf32> to vector<8x1xf32>
    %15 = vector.broadcast %14 : vector<8x1xf32> to vector<8x128xf32>
    %16 = arith.subf %3, %15 : vector<8x128xf32>
    %17 = math.exp %16 : vector<8x128xf32>
    %cst_5 = arith.constant dense<0.000000e+00> : vector<8xf32>
    %18 = vector.multi_reduction <add>, %17, %cst_5 [1] : vector<8x128xf32> to vector<8xf32>
    %19 = vector.shape_cast %18 : vector<8xf32> to vector<8x1xf32>
    %20 = math.log %19 : vector<8x1xf32>
    %21 = arith.addf %20, %14 : vector<8x1xf32>
    %22 = tpu.iota {dimensions = array<i32: 1>} : vector<8x128xi32>
    %23 = vector.broadcast %4 : vector<8x1xi32> to vector<8x128xi32>
    %24 = arith.cmpi eq, %22, %23 : vector<8x128xi32>
    %cst_6 = arith.constant 0.000000e+00 : f32
    %25 = vector.broadcast %cst_6 : f32 to vector<8x128xf32>
    %26 = arith.select %24, %3, %25 : vector<8x128xi1>, vector<8x128xf32>
    %cst_7 = arith.constant dense<0.000000e+00> : vector<8xf32>
    %27 = vector.multi_reduction <add>, %26, %cst_7 [1] : vector<8x128xf32> to vector<8xf32>
    %28 = vector.shape_cast %27 : vector<8xf32> to vector<8x1xf32>
    %29 = arith.subf %21, %28 : vector<8x1xf32>
    %cst_8 = arith.constant 0.000000e+00 : f32
    %30 = vector.broadcast %cst_8 : f32 to vector<8x1xf32>
    %31 = arith.select %12, %29, %30 : vector<8x1xi1>, vector<8x1xf32>
    %c0_9 = arith.constant 0 : index
    %c0_10 = arith.constant 0 : index
    %c0_11 = arith.constant 0 : index
    %32 = vector.load %arg4[%c0_9, %c0_10, %c0_11] : memref<1x1x1xf32, #tpu.memory_space<vmem>>, vector<1x1x1xf32>
    %33 = vector.shape_cast %31 : vector<8x1xf32> to vector<1x8x1xf32>
    %cst_12 = arith.constant dense<0.000000e+00> : vector<1xf32>
    %34 = vector.multi_reduction <add>, %33, %cst_12 [1, 2] : vector<1x8x1xf32> to vector<1xf32>
    %35 = vector.shape_cast %34 : vector<1xf32> to vector<1x1x1xf32>
    %36 = vector.extract %35[0, 0, 0] : f32 from vector<1x1x1xf32>
    %37 = vector.broadcast %36 : f32 to vector<1x1x1xf32>
    %38 = arith.addf %32, %37 : vector<1x1x1xf32>
    %c0_13 = arith.constant 0 : index
    %c0_14 = arith.constant 0 : index
    %c0_15 = arith.constant 0 : index
    %39 = vector.load %arg4[%c0_13, %c0_14, %c0_15] : memref<1x1x1xf32, #tpu.memory_space<vmem>>, vector<1x1x1xf32>
    tpu.vector_store %arg4[%c0_13, %c0_14, %c0_15], %38 {strides = array<i32>} : memref<1x1x1xf32, #tpu.memory_space<vmem>>, vector<1x1x1xf32>,
    return
  }
  func.func @transform_0(%arg0: i32, %arg1: i32) -> (i32, i32) {
    %c1_i32 = arith.constant 1 : i32
    %0 = arith.muli %arg0, %c1_i32 : i32
    %1 = arith.addi %0, %arg1 : i32
    %c0_i32 = arith.constant 0 : i32
    %2 = arith.minsi %1, %c0_i32 : i32
    %c0_i32_0 = arith.constant 0 : i32
    %c0_i32_1 = arith.constant 0 : i32
    return %2, %c0_i32_0 : i32, i32
  }
  func.func @transform_1(%arg0: i32, %arg1: i32) -> (i32, i32) {
    %c1_i32 = arith.constant 1 : i32
    %0 = arith.muli %arg0, %c1_i32 : i32
    %1 = arith.addi %0, %arg1 : i32
    %c0_i32 = arith.constant 0 : i32
    %2 = arith.minsi %1, %c0_i32 : i32
    %c0_i32_0 = arith.constant 0 : i32
    %c0_i32_1 = arith.constant 0 : i32
    return %2, %c0_i32_0 : i32, i32
  }
  func.func @transform_2(%arg0: i32, %arg1: i32) -> (i32, i32, i32) {
    %c0_i32 = arith.constant 0 : i32
    %c0_i32_0 = arith.constant 0 : i32
    %c0_i32_1 = arith.constant 0 : i32
    return %arg0, %c0_i32, %c0_i32_0 : i32, i32, i32
  }
}

</mosaic_0001>

<bundles_post_ra>
// kernel: tpu_custom_call.1
= control target key start
LH: loop header
LB: loop body
LE: loop exit
PB: predicated region body
PF: predicated region fallthrough
CT: control target
= control target key end

     0   :  { %s216_s0 = inlined_call_operand.vmem [shape: s32[8,1], index: 0, kind: input, shape index: {}]   ;;  %s217_s1 = inlined_call_operand.vmem [shape: f32[8,128], index: 1, kind: input, shape index: {}]   ;;  %s218_s2 = inlined_call_operand.hbm [shape: f32[1,1,1], index: 2, kind: output, shape index: {}]  }
   0x1   :  { %v72_v0 = vld [vmem:[%s217_s1] sm:$0xff] }
   0x2   :  { %7 = vsyncpa [#allocation3], 0  ;;  %81 = vmax.xlane.f32.xlu0 %v72_v0  ;;  %v178_v1 = vmov 0   ;;  %v73_v2 = vld [vmem:[%s216_s0] sm:$0xff]  ;;  %v91_v6 = vlaneseq  ;;  %vm103_vm1 = vcmask 7168   ;;  %vm70_vm2 = vcmask 0  }
   0x3   :  { %149 = vset.pattern.permute.xlu0 %v178_v1  ;;  %v179_v18 = vmov 0.0   ;;  %s180_s0 = smov [#allocation2]  }
   0x4   :  { %v92_v7 = vand.u32 127, %v91_v6  ;;  %71 = vst.msk [vmem:[#allocation2] sm:$0x1] %vm70_vm2, %v179_v18  ;;  %s124_s1 = sshll.u32 %s180_s0, 4  ;;  %s125_s1 = int_to_ptr.vmem [resolvable:$true] %s124_s1 }
   0x5   :  { %s154_s14 = scalar_lea.vmem %s125_s1, 16  ;;  %s158_s15 = scalar_lea.vmem %s125_s1, 32 }
   0x6   :  { %p155_p0 = scmp.ne.s32.totalorder %s125_s1, %s154_s14  ;;  %p159_p1 = scmp.lt.s32.totalorder %s125_s1, %s125_s1 }
   0x7   :  { %p160_p2 = scmp.lt.s32.totalorder %s158_s15, %s154_s14 }
   0x9   :  { %p161_p3 = por %p160_p2, %p159_p1 }
   0xb   :  { %v102_v26 = vld [vmem:[#allocation2] sm:$0x1]  ;;  %p162_p4 = pnand %p161_p3, %p155_p0 }
  0x18   :  { %94 = vperm.xlu0 %149, %v73_v2  }
  0x8f   :  { %v82_v3 = vpop.xlane.xlu0 %81 }
  0x90   :  { %v83_v4 = vsub.f32 %v72_v0, %v82_v3 }
  0x92   :  { %v84_v5 = vmul.f32 1.442695, %v83_v4 }
  0x94   :  { %150 = vpow2.f32 %v84_v5 }
  0x97   :  { %v95_v8 = vpop.permute.xlu0 %94 }
  0x98   :  { %vm96_vm0 = vcmp.eq.s32.totalorder %v92_v7, %v95_v8 }
  0x99   :  { %v97_v10 = vsel %vm96_vm0, %v72_v0, 0.0 }
  0x9e   :  { %v151_v9 = vpop.eup %150 }
  0x9f   :  { %86 = vadd.xlane.f32.xlu1 %v151_v9 }
  0xa3   :  { %98 = vadd.xlane.f32.xlu1 %v97_v10 }
 0x12c   :  { %v87_v11 = vpop.xlane.xlu1 %86 }
 0x12d   :  { %152 = vlog2.f32 %v87_v11 }
 0x130   :  { %v99_v14 = vpop.xlane.xlu1 %98 }
 0x137   :  { %v153_v12 = vpop.eup %152 }
 0x138   :  { %v89_v13 = vmul.f32 0.6931472, %v153_v12 }
 0x13a   :  { %v90_v15 = vadd.f32 %v89_v13, %v82_v3 }
 0x13c   :  { %v100_v16 = vsub.f32 %v90_v15, %v99_v14 }
 0x13e   :  { %v104_v17 = vsel %vm103_vm1, %v100_v16, 0.0 }
 0x13f   :  { %105 = vadd.xlane.f32.xlu1 %v104_v17 }
 0x1cc   :  { %v106_v19 = vpop.xlane.xlu1 %105 }
 0x1cd   :  { %v107_v20 = vrot.slane %v106_v19, 4 }
 0x1cf   :  { %v108_v21 = vadd.f32 %v107_v20, %v106_v19 }
 0x1d1   :  { %v109_v22 = vrot.slane %v108_v21, 2 }
 0x1d3   :  { %v110_v23 = vadd.f32 %v109_v22, %v108_v21 }
 0x1d5   :  { %v111_v24 = vrot.slane %v110_v23, 1 }
 0x1d7   :  { %v112_v25 = vadd.f32 %v111_v24, %v110_v23 }
 0x1d9   :  { %144 = vpush %v112_v25 }
 0x20a   :  { %s145_s13 = spop %144 }
 0x20b   :  { %v114_v27 = vstv %s145_s13 }
 0x20c   :  { %v115_v28 = vadd.f32 %v114_v27, %v102_v26 }
 0x20e   :  { %117 = vst.msk [vmem:[#allocation2] sm:$0x1] %vm70_vm2, %v115_v28 }
 0x20f   :  { %165 = shalt.err (!%p162_p4)
}
 0x210   :  { %s166_s18 = scalar_lea.hbm %s218_s2, 16 }
 0x211   :  { %p167_p5 = scmp.ne.s32.totalorder %s218_s2, %s166_s18  ;;  %p170_p6 = scmp.lt.u32.totalorder %s166_s18, %s218_s2 }
 0x213   :  { %p172_p7 = pnand %p170_p6, %p167_p5 }
 0x215   :  { %175 = shalt.err (!%p172_p7)
}
 0x216   :  { %127 = dma.vmem_to_hbm [thread:$0]  %s125_s1, 16, %s218_s2, [#allocation3]  }
 0x217   :  { %176 = dma.done.wait [#allocation3], 16  }
 0x218   :  { %177 = vsyncadd [#allocation3], 4294967280 }
 0x219   :  { %131 = vsyncpa [#allocation3], 1 }

</bundles_post_ra>
